<compile_context>
chip_gen: v6e
topology: v6e:2x2x1
jax: 0.10.0
libtpu: 0.0.40
codegen_flags: <defaults>
</compile_context>

<pallas_src>
import jax
import jax.numpy as jnp
from jax.experimental import pallas as pl
from jax.experimental.pallas import tpu as pltpu


# ----------------------------------------------------------------------------
# Pallas kernel: fully fused 2-layer GCN encoder, one invocation for all graphs
# ----------------------------------------------------------------------------
def _encoder_kernel(a_ref, x_ref, w1n_ref, bias1_ref, r_ref, w2_ref, b2_ref,
                    o_ref):
    # a_ref    : (B*N, B*N) block-diagonal D^-1/2 (A+I) D^-1/2 (A_hat per block)
    # x_ref    : (B*N, Fi)  raw node features, batch folded into rows
    # w1n_ref  : (Fi, H)    conv1 weight rows for the raw-feature columns
    # bias1_ref: (B*N, H)   A_hat @ (emb @ W1_emb) + b1, tiled over graphs
    # r_ref    : (B, B*N)   pooling matrix, row b = (1/N) 1^T A_hat on block b
    # w2_ref   : (H, H),  b2_ref: (1, H)
    # o_ref    : (B, H)

    # ---- GCNConv 1 (aggregate-first): (A_blk @ X) @ W1_node + bias1 ----
    agg_x = jnp.dot(a_ref[...], x_ref[...],
                    preferred_element_type=jnp.float32)            # (B*N, Fi)
    h = jnp.dot(agg_x, w1n_ref[...],
                preferred_element_type=jnp.float32) + bias1_ref[...]  # (B*N, H)

    # ---- ReLU (f32 VPU) ----
    h = jnp.maximum(h, 0.0)

    # ---- Dropout: module evaluated in inference mode -> identity ----
    # TODO(synk): training-mode dropout (p=0.5, scaled mask) not implemented.

    # ---- GCNConv 2 fused with node-mean: mean_n(A@(H@W2)+b2) = (R@H)@W2 + b2 ----
    pooled = jnp.dot(r_ref[...], h,
                     preferred_element_type=jnp.float32)            # (B, H)
    o_ref[...] = (jnp.dot(pooled, w2_ref[...],
                          preferred_element_type=jnp.float32)
                  + b2_ref[...])                                    # (B, H)


def encoder_pallas(a_blk, x_flat, w1n, bias1_full, r_mat, w2, b2):
    """All operands small -> whole-array VMEM refs, no grid (single invocation)."""
    B = r_mat.shape[0]
    H = w2.shape[1]
    vmem = pl.BlockSpec(memory_space=pltpu.MemorySpace.VMEM)
    return pl.pallas_call(
        _encoder_kernel,
        out_shape=jax.ShapeDtypeStruct((B, H), jnp.float32),
        in_specs=[vmem, vmem, vmem, vmem, vmem, vmem, vmem],
        out_specs=vmem,
    )(a_blk, x_flat, w1n, bias1_full, r_mat, w2, b2)


# ----------------------------------------------------------------------------
# Glue: parameters, embedding lookup, GCN adjacency normalization
# ----------------------------------------------------------------------------
def make_params(key, num_input, hidden_size):
    ks = jax.random.split(key, 5)
    fin = num_input + 12
    params = {
        "embed": jax.random.normal(ks[0], (8, 12), jnp.float32),   # nn.Embedding(8,12)
        "w1": jax.random.normal(ks[1], (fin, hidden_size), jnp.float32) * 0.1,
        "b1": jax.random.normal(ks[2], (1, hidden_size), jnp.float32) * 0.1,
        "w2": jax.random.normal(ks[3], (hidden_size, hidden_size), jnp.float32) * 0.1,
        "b2": jax.random.normal(ks[4], (1, hidden_size), jnp.float32) * 0.1,
    }
    return params


def gcn_normalized_adj(edge_index, num_nodes):
    """Dense symmetric-normalized adjacency with self loops (PyG GCNConv default).

    A_hat[t, s] = deg(t)^-1/2 * deg(s)^-1/2 for each edge s->t (and self loops).
    """
    src, dst = edge_index[0], edge_index[1]
    a = jnp.zeros((num_nodes, num_nodes), jnp.float32)
    a = a.at[dst, src].set(1.0)                      # message flows src -> dst
    a = a + jnp.eye(num_nodes, dtype=jnp.float32)    # add self loops
    deg = jnp.sum(a, axis=1)
    dinv = jnp.where(deg > 0, 1.0 / jnp.sqrt(deg), 0.0)
    return dinv[:, None] * a * dinv[None, :]


def encoder_forward(params, node, node_type, edge_index):
    """node: (B, N, num_input) f32; node_type: (N,) int32; edge_index: (2, E) int32."""
    num_graph, num_nodes, num_input = node.shape

    a_hat = gcn_normalized_adj(edge_index, num_nodes)              # (N, N)
    eye_b = jnp.eye(num_graph, dtype=jnp.float32)
    a_blk = jnp.kron(eye_b, a_hat)                                 # (B*N, B*N)

    # Pooling matrix: node-mean commutes with the (linear) second conv.
    r = jnp.mean(a_hat, axis=0, keepdims=True)                     # (1, N)
    r_mat = jnp.kron(eye_b, r)                                     # (B, B*N)

    # Split the concat: fold the (shared) embedding columns of W1 into a
    # per-node bias after aggregation; only raw node features stream per graph.
    emb = params["embed"][node_type]                               # (N, 12)
    w1n = params["w1"][:num_input]                                 # (Fi, H)
    w1e = params["w1"][num_input:]                                 # (12, H)
    bias1 = a_hat @ (emb @ w1e) + params["b1"]                     # (N, H)
    bias1_full = jnp.tile(bias1, (num_graph, 1))                   # (B*N, H)

    x_flat = node.reshape(num_graph * num_nodes, num_input)        # (B*N, Fi)
    return encoder_pallas(a_blk, x_flat, w1n, bias1_full, r_mat,
                          params["w2"], params["b2"])              # (B, H)


# ----------------------------------------------------------------------------
# Reference (pure JAX) for sanity checking
# ----------------------------------------------------------------------------
def encoder_reference(params, node, node_type, edge_index):
    num_graph, num_nodes, _ = node.shape
    nt = jnp.broadcast_to(node_type[None, :], (num_graph, num_nodes))
    x = jnp.concatenate([node, params["embed"][nt]], axis=2)
    a = gcn_normalized_adj(edge_index, num_nodes)
    h = jnp.einsum("ij,bjf->bif", a, x @ params["w1"]) + params["b1"][None]
    h = jnp.maximum(h, 0.0)
    h2 = jnp.einsum("ij,bjf->bif", a, h @ params["w2"]) + params["b2"][None]
    return jnp.mean(h2, axis=1)


if __name__ == "__main__":
    key = jax.random.PRNGKey(0)
    k_param, k_node, k_type = jax.random.split(key, 3)

    num_graph = 2          # B
    num_nodes = 8          # N
    num_input = 4          # raw node feature dim
    hidden_size = 32       # H

    params = make_params(k_param, num_input, hidden_size)

    node = jax.random.normal(k_node, (num_graph, num_nodes, num_input), jnp.float32)
    node_type = jax.random.randint(k_type, (num_nodes,), 0, 8, jnp.int32)
    # a simple ring graph (bidirectional)
    srcs = jnp.arange(num_nodes, dtype=jnp.int32)
    dsts = (srcs + 1) % num_nodes
    edge_index = jnp.stack([jnp.concatenate([srcs, dsts]),
                            jnp.concatenate([dsts, srcs])], axis=0)  # (2, 2N)

    out = encoder_forward(params, node, node_type, edge_index)
    out = jax.block_until_ready(out)

    ref = encoder_reference(params, node, node_type, edge_index)
    assert out.shape == (num_graph, hidden_size), out.shape
    assert jnp.allclose(out, ref, atol=1e-3, rtol=1e-3), "mismatch vs reference"

    print("KERNEL_OK")
</pallas_src>

<mosaic_0001>
module attributes {stable_mosaic.version = 11 : i64} {
  func.func @_encoder_kernel(%arg0: memref<16x16xf32, #tpu.memory_space<vmem>>, %arg1: memref<16x4xf32, #tpu.memory_space<vmem>>, %arg2: memref<4x32xf32, #tpu.memory_space<vmem>>, %arg3: memref<16x32xf32, #tpu.memory_space<vmem>>, %arg4: memref<2x16xf32, #tpu.memory_space<vmem>>, %arg5: memref<32x32xf32, #tpu.memory_space<vmem>>, %arg6: memref<1x32xf32, #tpu.memory_space<vmem>>, %arg7: memref<2x32xf32, #tpu.memory_space<vmem>>) attributes {dimension_semantics = [], scalar_prefetch = 0 : i64, scratch_operands = 0 : i64, tpu.core_type = #tpu.core_type<tc>} {
    %c0 = arith.constant 0 : index
    %c0_0 = arith.constant 0 : index
    %0 = vector.load %arg0[%c0, %c0_0] : memref<16x16xf32, #tpu.memory_space<vmem>>, vector<16x16xf32>
    %c0_1 = arith.constant 0 : index
    %c0_2 = arith.constant 0 : index
    %1 = vector.load %arg1[%c0_1, %c0_2] : memref<16x4xf32, #tpu.memory_space<vmem>>, vector<16x4xf32>
    %cst = arith.constant dense<0.000000e+00> : vector<16x4xf32>
    %2 = tpu.matmul %0, %1, %cst {dimension_numbers = #tpu.dot_dimension_numbers<[1], [0], [0], [1], [0, 0, 1, 1], [], []>} : vector<16x16xf32>, vector<16x4xf32>, vector<16x4xf32> -> vector<16x4xf32>
    %c0_3 = arith.constant 0 : index
    %c0_4 = arith.constant 0 : index
    %3 = vector.load %arg2[%c0_3, %c0_4] : memref<4x32xf32, #tpu.memory_space<vmem>>, vector<4x32xf32>
    %cst_5 = arith.constant dense<0.000000e+00> : vector<16x32xf32>
    %4 = tpu.matmul %2, %3, %cst_5 {dimension_numbers = #tpu.dot_dimension_numbers<[1], [0], [0], [1], [0, 0, 1, 1], [], []>} : vector<16x4xf32>, vector<4x32xf32>, vector<16x32xf32> -> vector<16x32xf32>
    %c0_6 = arith.constant 0 : index
    %c0_7 = arith.constant 0 : index
    %5 = vector.load %arg3[%c0_6, %c0_7] : memref<16x32xf32, #tpu.memory_space<vmem>>, vector<16x32xf32>
    %6 = arith.addf %4, %5 : vector<16x32xf32>
    %cst_8 = arith.constant 0.000000e+00 : f32
    %7 = vector.broadcast %cst_8 : f32 to vector<16x32xf32>
    %8 = arith.maximumf %6, %7 : vector<16x32xf32>
    %c0_9 = arith.constant 0 : index
    %c0_10 = arith.constant 0 : index
    %9 = vector.load %arg4[%c0_9, %c0_10] : memref<2x16xf32, #tpu.memory_space<vmem>>, vector<2x16xf32>
    %cst_11 = arith.constant dense<0.000000e+00> : vector<2x32xf32>
    %10 = tpu.matmul %9, %8, %cst_11 {dimension_numbers = #tpu.dot_dimension_numbers<[1], [0], [0], [1], [0, 0, 1, 1], [], []>} : vector<2x16xf32>, vector<16x32xf32>, vector<2x32xf32> -> vector<2x32xf32>
    %c0_12 = arith.constant 0 : index
    %c0_13 = arith.constant 0 : index
    %11 = vector.load %arg5[%c0_12, %c0_13] : memref<32x32xf32, #tpu.memory_space<vmem>>, vector<32x32xf32>
    %cst_14 = arith.constant dense<0.000000e+00> : vector<2x32xf32>
    %12 = tpu.matmul %10, %11, %cst_14 {dimension_numbers = #tpu.dot_dimension_numbers<[1], [0], [0], [1], [0, 0, 1, 1], [], []>} : vector<2x32xf32>, vector<32x32xf32>, vector<2x32xf32> -> vector<2x32xf32>
    %c0_15 = arith.constant 0 : index
    %c0_16 = arith.constant 0 : index
    %13 = vector.load %arg6[%c0_15, %c0_16] : memref<1x32xf32, #tpu.memory_space<vmem>>, vector<1x32xf32>
    %14 = vector.broadcast %13 : vector<1x32xf32> to vector<2x32xf32>
    %15 = arith.addf %12, %14 : vector<2x32xf32>
    %c0_17 = arith.constant 0 : index
    %c0_18 = arith.constant 0 : index
    %16 = vector.load %arg7[%c0_17, %c0_18] : memref<2x32xf32, #tpu.memory_space<vmem>>, vector<2x32xf32>
    tpu.vector_store %arg7[%c0_17, %c0_18], %15 {strides = array<i32>} : memref<2x32xf32, #tpu.memory_space<vmem>>, vector<2x32xf32>,
    return
  }
}

</mosaic_0001>

<bundles_post_ra>
// kernel: tpu_custom_call.1
= control target key start
LH: loop header
LB: loop body
LE: loop exit
PB: predicated region body
PF: predicated region fallthrough
CT: control target
= control target key end

     0   :  { %12 = vsyncpa [#allocation3], 0  ;;  %s615_s0 = inlined_call_operand.vmem [shape: f32[16,16], index: 0, kind: input, shape index: {}]   ;;  %s616_s1 = inlined_call_operand.vmem [shape: f32[16,4], index: 1, kind: input, shape index: {}]   ;;  %s617_s2 = inlined_call_operand.vmem [shape: f32[4,32], index: 2, kind: input, shape index: {}]   ;;  %s618_s3 = inlined_call_operand.hbm [shape: f32[16,32], index: 3, kind: input, shape index: {}]   ;;  %s619_s4 = inlined_call_operand.vmem [shape: f32[2,16], index: 4, kind: input, shape index: {}]   ;;  %s620_s5 = inlined_call_operand.hbm [shape: f32[32,32], index: 5, kind: input, shape index: {}]   ;;  %s621_s6 = inlined_call_operand.vmem [shape: f32[1,32], index: 6, kind: input, shape index: {}]   ;;  %s622_s7 = inlined_call_operand.hbm [shape: f32[2,32], index: 7, kind: output, shape index: {}]  }
   0x1   :  { %13 = vsyncpa [#allocation6], 0 }
   0x2   :  { %14 = vsyncpa [#allocation4], 0  ;;  %s535_s24 = smov [#allocation2]  }
   0x3   :  { %s26_s25 = sshll.u32 %s535_s24, 4  ;;  %s27_s25 = int_to_ptr.vmem [resolvable:$true] %s26_s25 }
   0x4   :  { %s477_s26 = scalar_lea.vmem %s27_s25, 256  ;;  %p482_p1 = scmp.lt.s32.totalorder %s27_s25, %s27_s25 }
   0x5   :  { %p478_p0 = scmp.ne.s32.totalorder %s27_s25, %s477_s26  ;;  %p483_p2 = scmp.lt.s32.totalorder %s477_s26, %s477_s26 }
   0x7   :  { %p484_p3 = por %p483_p2, %p482_p1 }
   0x9   :  { %p485_p4 = pnand %p484_p3, %p478_p0 }
   0xb   :  { %488 = shalt.err (!%p485_p4)
}
   0xc   :  { %s536_s27 = smov 128   ;;  %s537_s28 = smov 8  }
   0xd   :  { %32 = dma.hbm_to_vmem [thread:$0]  %s618_s3, 256, %s27_s25, [#allocation3], %s536_s27, %s536_s27, %s537_s28  }
   0xe   :  { %s538_s8 = smov [#allocation5]  }
   0xf   :  { %s40_s9 = sshll.u32 %s538_s8, 4  ;;  %s41_s9 = int_to_ptr.vmem [resolvable:$true] %s40_s9 }
  0x10   :  { %s497_s10 = scalar_lea.vmem %s41_s9, 512  ;;  %p502_p6 = scmp.lt.s32.totalorder %s41_s9, %s41_s9 }
  0x11   :  { %p498_p5 = scmp.ne.s32.totalorder %s41_s9, %s497_s10  ;;  %p503_p7 = scmp.lt.s32.totalorder %s497_s10, %s497_s10 }
  0x13   :  { %p504_p8 = por %p503_p7, %p502_p6 }
  0x15   :  { %p505_p9 = pnand %p504_p8, %p498_p5 }
  0x17   :  { %508 = shalt.err (!%p505_p9)
}
  0x18   :  { %46 = dma.hbm_to_vmem [thread:$0]  %s620_s5, 512, %s41_s9, [#allocation6], %s536_s27, %s536_s27, %s537_s28  }
  0x19   :  { %529 = dma.done.wait [#allocation3], 256  }
  0x1a   :  { %530 = vsyncadd [#allocation3], 4294967040 }
  0x1b   :  { %531 = dma.done.wait [#allocation6], 512  }
  0x1c   :  { %532 = vsyncadd [#allocation6], 4294966784  ;;  %vm59_vm0 = vcmask 130048   ;;  %v58_v0 = vld [vmem:[%s616_s1 + $0x8] sm:$0xff]  ;;  %v57_v1 = vld [vmem:[%s616_s1] sm:$0xff]  ;;  %vm151_vm1 = vcmask 1043456  }
  0x1d   :  { %v55_v2 = vld [vmem:[%s615_s0] sm:$0xff]  ;;  %432 = vmatprep.subr.mxu0 %v58_v0  ;;  %v56_v3 = vld [vmem:[%s615_s0 + $0x8] sm:$0xff]  ;;  %vm144_vm2 = vcmask 31744   ;;  %v539_v7 = vmov 0.0   ;;  %vm540_vm3 = vmmov 0   ;;  %v307_v10 = vld [vmem:[#allocation5 + $0x8] sm:$0xff] }
  0x1e   :  { %436 = vmatprep.mubr.msk.f32.mxu0 %vm59_vm0, %v55_v2  ;;  %433 = vmatpush3.msra.mxu0 %v58_v0  ;;  %v141_v4 = vld [vmem:[%s617_s2] sm:$0xf]  ;;  %v309_v8 = vld [vmem:[#allocation5 + $0x18] sm:$0xff]  ;;  %v306_v20 = vld [vmem:[#allocation5] sm:$0xff]  ;;  %vm317_vm4 = vcmask 261120   ;;  %s541_s22 = smov [#allocation7]  }
  0x1f   :  { %434 = vmatprep.subr.mxu0 %v57_v1  ;;  %439 = vmatprep.subr.msk.mxu1 %vm151_vm1, %v141_v4  ;;  %v308_v9 = vld [vmem:[#allocation5 + $0x10] sm:$0xff]  ;;  %v143_v11 = vld [vmem:[#allocation2 + $0x8] sm:$0xff]  ;;  %s399_s23 = sshll.u32 %s541_s22, 4  ;;  %vm391_vm5 = vcmask 254976   ;;  %s400_s23 = int_to_ptr.vmem [resolvable:$true] %s399_s23 }
  0x20   :  { %435 = vmatpush3.msra.mxu0 %v57_v1  ;;  %440 = vmatpush3.msk.msra.mxu1 %vm151_vm1, %v141_v4  ;;  %v142_v13 = vld [vmem:[#allocation2] sm:$0xff]  ;;  %p514_p11 = scmp.lt.s32.totalorder %s400_s23, %s400_s23 }
  0x21   :  { %437 = vmatmul.mubr.msk.f32.vlgmr.msra.gmra.mxu0 %vm59_vm0, %v56_v3  ;;  %444 = vmatprep.subr.mxu1 %v539_v7  ;;  %v232_v19 = vld [vmem:[%s619_s4] sm:$0x3]  ;;  %s509_s4 = scalar_lea.vmem %s400_s23, 32 }
  0x22   :  { %451 = vmatprep.subr.mxu0 %v539_v7  ;;  %459 = vmatprep.mubr.msk.f32.mxu0 %vm540_vm3, %v539_v7  ;;  %v415_v23 = vld [vmem:[%s621_s6] ss:$0 sm:$0xff]  ;;  %p510_p10 = scmp.ne.s32.totalorder %s400_s23, %s509_s4  ;;  %p515_p12 = scmp.lt.s32.totalorder %s509_s4, %s509_s4 }
  0x23   :  { %452 = vmatpush3.msra.mxu0 %v309_v8 }
  0x24   :  { %453 = vmatprep.subr.mxu0 %v539_v7  ;;  %p516_p13 = por %p515_p12, %p514_p11 }
  0x25   :  { %454 = vmatpush3.msra.mxu0 %v308_v9 }
  0x26   :  { %455 = vmatprep.subr.mxu0 %v539_v7  ;;  %p517_p0 = pnand %p516_p13, %p510_p10 }
  0x27   :  { %456 = vmatpush3.msra.mxu0 %v307_v10 }
  0x28   :  { %457 = vmatprep.subr.mxu0 %v539_v7 }
  0x29   :  { %458 = vmatpush3.msra.mxu0 %v306_v20 }
  0xe1   :  { %v438_v5 = vpop.f32.mrf.mxu0 }
  0xe3   :  { %v132_v6 = vpop.f32.mrf.mxu0 }
  0xe4   :  { %441 = vmatprep.mubr.msk.f32.mxu1 %vm144_vm2, %v132_v6 }
  0xe5   :  { %442 = vmatmul.mubr.msk.f32.vlgmr.msra.gmra.mxu1 %vm144_vm2, %v438_v5 }
  0xe6   :  { %448 = vmatprep.mubr.msk.f32.mxu1 %vm540_vm3, %v539_v7 }
 0x1a5   :  { %v443_v12 = vpop.f32.mrf.mxu1 }
 0x1a6   :  { %v227_v14 = vadd.f32 %v443_v12, %v143_v11 }
 0x1a7   :  { %v221_v15 = vpop.f32.mrf.mxu1 }
 0x1a8   :  { %v231_v16 = vmax.f32 %v227_v14, 0.0  ;;  %v222_v17 = vadd.f32 %v221_v15, %v142_v13 }
 0x1aa   :  { %v230_v18 = vmax.f32 %v222_v17, 0.0  ;;  %445 = vmatpush3.msra.mxu1 %v231_v16 }
 0x1ab   :  { %446 = vmatprep.subr.mxu1 %v539_v7 }
 0x1ac   :  { %447 = vmatpush3.msra.mxu1 %v230_v18 }
 0x1ad   :  { %449 = vmatmul.mubr.msk.f32.vlgmr.msra.gmra.mxu1 %vm59_vm0, %v232_v19 }
 0x26d   :  { %v302_v21 = vpop.f32.mrf.mxu1 }
 0x26e   :  { %460 = vmatmul.mubr.msk.f32.vlgmr.msra.gmra.mxu0 %vm317_vm4, %v302_v21 }
 0x26f   :  { %v450_v22 = vpop.f32.mrf.mxu1 }
 0x32e   :  { %v387_v24 = vpop.f32.mrf.mxu0 }
 0x32f   :  { %v388_v25 = vadd.f32 %v415_v23, %v387_v24 }
 0x330   :  { %v461_v26 = vpop.f32.mrf.mxu0 }
 0x331   :  { %392 = vst.msk [vmem:[#allocation7] sm:$0x3] %vm391_vm5, %v388_v25 }
 0x332   :  { %520 = shalt.err (!%p517_p0)
}
 0x333   :  { %402 = dma.vmem_to_hbm [thread:$0]  %s400_s23, 32, %s622_s7, [#allocation4]  }
 0x334   :  { %533 = dma.done.wait [#allocation4], 32  }
 0x335   :  { %534 = vsyncadd [#allocation4], 4294967264 }
 0x336   :  { %406 = vsyncpa [#allocation3], 1 }
 0x337   :  { %407 = vsyncpa [#allocation6], 1 }
 0x338   :  { %408 = vsyncpa [#allocation4], 1 }

</bundles_post_ra>
